<compile_context>
chip_gen: v7x
topology: tpu7x:2x2x1
jax: 0.10.0
libtpu: 0.0.40
codegen_flags: <defaults>
</compile_context>

<pallas_src>
import jax
import jax.numpy as jnp
from jax import lax
from jax.experimental import pallas as pl
from jax.experimental.pallas import tpu as pltpu


def _round_up(x, m):
    return ((x + m - 1) // m) * m


def _pick_row_block(total_rows, target=512, multiple=8):
    """Largest divisor of total_rows that is a multiple of `multiple` and <= target."""
    best = multiple
    cand = multiple
    while cand <= total_rows and cand <= target:
        if total_rows % cand == 0:
            best = cand
        cand += multiple
    return best


# ---------------------------------------------------------------------------
# Kernel 0: input projection pre-pass (all timesteps, one batched matmul)
# ---------------------------------------------------------------------------
def input_proj_kernel(
    x_ref,      # (R_BLK, F)        bf16
    wih_ref,    # (F, 4*H_pad)      bf16
    b_ref,      # (1, 4*H_pad)      f32   (b_ih + b_hh), gate-block padded
    gx_ref,     # (R_BLK, 4*H_pad)  f32   gate pre-activations from x
):
    gx_ref[...] = (
        jnp.dot(x_ref[...], wih_ref[...], preferred_element_type=jnp.float32)
        + b_ref[...]
    )


# ---------------------------------------------------------------------------
# Kernel 1: the LSTM recurrence (time chunked; only h @ W_hh on the hot path)
# ---------------------------------------------------------------------------
def lstm_recurrence_kernel(
    gx_ref,     # (T_BLK, B_pad, 4*H_pad) f32   precomputed x@W_ih^T + bias
    whh_ref,    # (H_pad, 4*H_pad)        bf16
    hs_ref,     # (T_BLK, B_pad, H_pad)   bf16  output hidden states
    h_sc,       # (B_pad, H_pad)          f32   scratch: hidden state carry
    c_sc,       # (B_pad, H_pad)          f32   scratch: cell state carry
):
    Hp = h_sc.shape[1]
    t_blk = gx_ref.shape[0]

    @pl.when(pl.program_id(0) == 0)
    def _():
        h_sc[...] = jnp.zeros_like(h_sc)
        c_sc[...] = jnp.zeros_like(c_sc)

    def step(t, carry):
        h, c = carry                                   # f32 (B_pad, H_pad)
        # gates = (x_t @ W_ih^T + b)  +  h @ W_hh^T    -> (B_pad, 4*H_pad)
        gates = gx_ref[t] + jnp.dot(
            h.astype(jnp.bfloat16), whh_ref[...],
            preferred_element_type=jnp.float32)
        # packed gate order: i, f, o, g  -> one sigmoid over a 3*Hp slab,
        # tanh over the trailing Hp slab.
        sig = jax.nn.sigmoid(gates[:, : 3 * Hp])
        i_g = sig[:, 0 * Hp:1 * Hp]
        f_g = sig[:, 1 * Hp:2 * Hp]
        o_g = sig[:, 2 * Hp:3 * Hp]
        g_g = jnp.tanh(gates[:, 3 * Hp:4 * Hp])
        c = f_g * c + i_g * g_g
        h = o_g * jnp.tanh(c)
        hs_ref[t] = h.astype(jnp.bfloat16)             # lane-dense bf16 store
        return (h, c)

    # Cap the unroll factor so larger t_blk does not blow the 64-vreg file.
    h_fin, c_fin = lax.fori_loop(
        0, t_blk, step, (h_sc[...], c_sc[...]), unroll=min(t_blk, 8))
    h_sc[...] = h_fin
    c_sc[...] = c_fin


# ---------------------------------------------------------------------------
# Kernel 2: the non-recurrent head, batched over all (t, b) rows
# ---------------------------------------------------------------------------
def mlp_head_kernel(
    hs_ref,     # (R_BLK, H_pad)    bf16
    wc_ref,     # (H_pad, H_pad)    bf16   combination_layer weight^T
    bc_ref,     # (1, H_pad)        f32
    wp_ref,     # (H_pad, TAG_pad)  bf16   projection weight^T
    bp_ref,     # (1, TAG_pad)      f32
    out_ref,    # (R_BLK, TAG_pad)  f32
):
    z = (jnp.dot(hs_ref[...], wc_ref[...], preferred_element_type=jnp.float32)
         + bc_ref[...])
    z = jnp.maximum(z, 0.0).astype(jnp.bfloat16)       # relu (dropout = identity)
    out_ref[...] = (
        jnp.dot(z, wp_ref[...], preferred_element_type=jnp.float32) + bp_ref[...]
    )


# ---------------------------------------------------------------------------
# Wrapper
# ---------------------------------------------------------------------------
def lstm_seq_classifier(x, packed, tag_size, *, t_blk=8, row_block_target=512):
    """x: (B, T, F) f32, batch_first like the PyTorch module -> (B, T, TAG) f32."""
    B, T, F = x.shape
    Hp = packed["w_hh_t"].shape[0]
    TAGp = packed["w_proj_t"].shape[1]

    B_pad = _round_up(B, 8)          # f32 sublane tile
    T_pad = _round_up(T, t_blk)
    R = T_pad * B_pad

    # Zero-pad (padded rows/steps stay zero), go time-major, cast to bf16 once.
    x_p = jnp.pad(x, ((0, B_pad - B), (0, T_pad - T), (0, 0)))
    x_tm = jnp.transpose(x_p, (1, 0, 2)).astype(jnp.bfloat16)   # (T_pad, B_pad, F)
    x_flat = x_tm.reshape(R, F)

    full = lambda a: pl.BlockSpec(a.shape, lambda g: (0,) * a.ndim)
    r_blk = _pick_row_block(R, target=row_block_target)

    # ---- pre-pass: gate pre-activations from x for ALL timesteps ----
    gx_flat = pl.pallas_call(
        input_proj_kernel,
        out_shape=jax.ShapeDtypeStruct((R, 4 * Hp), jnp.float32),
        grid_spec=pltpu.PrefetchScalarGridSpec(
            num_scalar_prefetch=0,
            grid=(R // r_blk,),
            in_specs=[
                pl.BlockSpec((r_blk, F), lambda r: (r, 0)),
                full(packed["w_ih_t"]),
                full(packed["b_lstm"]),
            ],
            out_specs=pl.BlockSpec((r_blk, 4 * Hp), lambda r: (r, 0)),
        ),
        compiler_params=pltpu.CompilerParams(
            dimension_semantics=("parallel",),
        ),
    )(x_flat, packed["w_ih_t"], packed["b_lstm"])
    gx = gx_flat.reshape(T_pad, B_pad, 4 * Hp)

    # ---- recurrence: emit hidden states (T_pad, B_pad, H_pad) bf16 ----
    hs = pl.pallas_call(
        lstm_recurrence_kernel,
        out_shape=jax.ShapeDtypeStruct((T_pad, B_pad, Hp), jnp.bfloat16),
        grid_spec=pltpu.PrefetchScalarGridSpec(
            num_scalar_prefetch=0,
            grid=(T_pad // t_blk,),
            in_specs=[
                pl.BlockSpec((t_blk, B_pad, 4 * Hp), lambda t: (t, 0, 0)),
                full(packed["w_hh_t"]),
            ],
            out_specs=pl.BlockSpec((t_blk, B_pad, Hp), lambda t: (t, 0, 0)),
            scratch_shapes=[
                pltpu.VMEM((B_pad, Hp), jnp.float32),   # h carry
                pltpu.VMEM((B_pad, Hp), jnp.float32),   # c carry
            ],
        ),
        compiler_params=pltpu.CompilerParams(
            dimension_semantics=("arbitrary",),         # carried recurrence
        ),
    )(gx, packed["w_hh_t"])

    # ---- head: one batched matmul chain over all T_pad*B_pad rows ----
    hs_flat = hs.reshape(R, Hp)
    logits_flat = pl.pallas_call(
        mlp_head_kernel,
        out_shape=jax.ShapeDtypeStruct((R, TAGp), jnp.float32),
        grid_spec=pltpu.PrefetchScalarGridSpec(
            num_scalar_prefetch=0,
            grid=(R // r_blk,),
            in_specs=[
                pl.BlockSpec((r_blk, Hp), lambda r: (r, 0)),
                full(packed["w_comb_t"]),
                full(packed["b_comb"]),
                full(packed["w_proj_t"]),
                full(packed["b_proj"]),
            ],
            out_specs=pl.BlockSpec((r_blk, TAGp), lambda r: (r, 0)),
        ),
        compiler_params=pltpu.CompilerParams(
            dimension_semantics=("parallel",),
        ),
    )(hs_flat, packed["w_comb_t"], packed["b_comb"],
      packed["w_proj_t"], packed["b_proj"])

    logits = logits_flat.reshape(T_pad, B_pad, TAGp)[:T, :B, :tag_size]
    return jnp.transpose(logits, (1, 0, 2))             # back to (B, T, TAG)


# ---------------------------------------------------------------------------
# Parameters
# ---------------------------------------------------------------------------
def init_params(key, feat_size, hidden_size, tag_size):
    """Raw PyTorch-shaped params, uniform(-1/sqrt(H), 1/sqrt(H)) init."""
    ks = jax.random.split(key, 8)
    H, F, TAG = hidden_size, feat_size, tag_size
    bound = 1.0 / jnp.sqrt(jnp.float32(H))
    u = lambda k, shape: jax.random.uniform(k, shape, jnp.float32, -bound, bound)
    return {
        "w_ih": u(ks[0], (4 * H, F)),     # nn.LSTM weight_ih_l0  (i,f,g,o)
        "w_hh": u(ks[1], (4 * H, H)),     # nn.LSTM weight_hh_l0
        "b_ih": u(ks[2], (4 * H,)),
        "b_hh": u(ks[3], (4 * H,)),
        "w_comb": u(ks[4], (H, H)),       # combination_layer
        "b_comb": u(ks[5], (H,)),
        "w_proj": u(ks[6], (TAG, H)),     # projection
        "b_proj": u(ks[7], (TAG,)),
    }


def pack_params(raw, *, lane=128):
    """Transpose / per-gate zero-pad to lane multiples / reorder gates to
    (i, f, o, g) so sigmoid gates are one contiguous slab / cast to bf16 ONCE."""
    H = raw["w_hh"].shape[1]
    TAG = raw["w_proj"].shape[0]
    Hp = _round_up(H, lane)
    TAGp = _round_up(TAG, lane)
    order = jnp.asarray([0, 1, 3, 2])     # PyTorch (i,f,g,o) -> packed (i,f,o,g)

    def pad_gates(w):                     # (4H, in) -> (in, 4*Hp), gate-block pad
        inn = w.shape[1]
        w4 = w.reshape(4, H, inn)[order]
        w4 = jnp.pad(w4, ((0, 0), (0, Hp - H), (0, 0)))
        return jnp.transpose(w4, (2, 0, 1)).reshape(inn, 4 * Hp)

    w_ih_t = pad_gates(raw["w_ih"])                                   # (F, 4Hp)
    w_hh_t = jnp.pad(pad_gates(raw["w_hh"]), ((0, Hp - H), (0, 0)))   # (Hp, 4Hp)
    b4 = (raw["b_ih"] + raw["b_hh"]).reshape(4, H)[order]
    b_lstm = jnp.pad(b4, ((0, 0), (0, Hp - H))).reshape(1, 4 * Hp)

    w_comb_t = jnp.pad(raw["w_comb"].T, ((0, Hp - H), (0, Hp - H)))   # (Hp, Hp)
    b_comb = jnp.pad(raw["b_comb"], (0, Hp - H)).reshape(1, Hp)
    w_proj_t = jnp.pad(raw["w_proj"].T, ((0, Hp - H), (0, TAGp - TAG)))  # (Hp,TAGp)
    b_proj = jnp.pad(raw["b_proj"], (0, TAGp - TAG)).reshape(1, TAGp)

    return {
        "w_ih_t": w_ih_t.astype(jnp.bfloat16),
        "w_hh_t": w_hh_t.astype(jnp.bfloat16),
        "b_lstm": b_lstm.astype(jnp.float32),
        "w_comb_t": w_comb_t.astype(jnp.bfloat16),
        "b_comb": b_comb.astype(jnp.float32),
        "w_proj_t": w_proj_t.astype(jnp.bfloat16),
        "b_proj": b_proj.astype(jnp.float32),
    }


# ---------------------------------------------------------------------------
# Pure-JAX f32 reference (matches PyTorch LSTMSeqClassifier.eval())
# ---------------------------------------------------------------------------
def reference_forward(x, raw):
    B, T, F = x.shape
    H = raw["w_hh"].shape[1]
    w_ih_t, w_hh_t = raw["w_ih"].T, raw["w_hh"].T
    b = (raw["b_ih"] + raw["b_hh"])[None, :]

    def step(carry, x_t):
        h, c = carry
        gates = x_t @ w_ih_t + h @ w_hh_t + b
        i = jax.nn.sigmoid(gates[:, 0 * H:1 * H])
        f = jax.nn.sigmoid(gates[:, 1 * H:2 * H])
        g = jnp.tanh(gates[:, 2 * H:3 * H])
        o = jax.nn.sigmoid(gates[:, 3 * H:4 * H])
        c = f * c + i * g
        h = o * jnp.tanh(c)
        return (h, c), h

    h0 = jnp.zeros((B, H), jnp.float32)
    c0 = jnp.zeros((B, H), jnp.float32)
    _, hs = jax.lax.scan(step, (h0, c0), jnp.transpose(x, (1, 0, 2)))
    hs = jnp.transpose(hs, (1, 0, 2))                    # (B, T, H)
    hc = jnp.maximum(hs @ raw["w_comb"].T + raw["b_comb"][None], 0.0)
    return hc @ raw["w_proj"].T + raw["b_proj"][None]


if __name__ == "__main__":
    B, T, F, H, TAG = 2, 8, 16, 32, 5

    key = jax.random.PRNGKey(0)
    k_x, k_p = jax.random.split(key)
    x = jax.random.normal(k_x, (B, T, F), jnp.float32)
    raw = init_params(k_p, feat_size=F, hidden_size=H, tag_size=TAG)
    packed = pack_params(raw)

    logits = jax.block_until_ready(lstm_seq_classifier(x, packed, TAG, t_blk=8))
    ref = jax.block_until_ready(reference_forward(x, raw))

    assert logits.shape == (B, T, TAG)
    err = float(jnp.max(jnp.abs(logits - ref)))
    # bf16 matmul operands / bf16 hs (f32 accumulation, f32 h/c state) -> relaxed tol
    assert jnp.allclose(logits, ref, atol=2e-2, rtol=2e-2), f"mismatch, max err {err}"
    print("KERNEL_OK")
</pallas_src>

<mosaic_0001>
module attributes {stable_mosaic.version = 11 : i64} {
  func.func @input_proj_kernel(%arg0: i32, %arg1: memref<64x16xbf16, #tpu.memory_space<vmem>>, %arg2: memref<16x512xbf16, #tpu.memory_space<vmem>>, %arg3: memref<1x512xf32, #tpu.memory_space<vmem>>, %arg4: memref<64x512xf32, #tpu.memory_space<vmem>>) attributes {dimension_semantics = [#tpu.dimension_semantics<parallel>], iteration_bounds = array<i64: 1>, scalar_prefetch = 0 : i64, scratch_operands = 0 : i64, tpu.core_type = #tpu.core_type<tc>, window_params = [{transform_indices = @transform_0, window_bounds = array<i64: 64, 16>}, {pipeline_mode = #tpu.pipeline_mode<synchronous>, transform_indices = @transform_1, window_bounds = array<i64: 16, 512>}, {pipeline_mode = #tpu.pipeline_mode<synchronous>, transform_indices = @transform_2, window_bounds = array<i64: 1, 512>}, {transform_indices = @transform_3, window_bounds = array<i64: 64, 512>}]} {
    %c0 = arith.constant 0 : index
    %c0_0 = arith.constant 0 : index
    %0 = vector.load %arg1[%c0, %c0_0] : memref<64x16xbf16, #tpu.memory_space<vmem>>, vector<64x16xbf16>
    %c0_1 = arith.constant 0 : index
    %c0_2 = arith.constant 0 : index
    %1 = vector.load %arg2[%c0_1, %c0_2] : memref<16x512xbf16, #tpu.memory_space<vmem>>, vector<16x512xbf16>
    %cst = arith.constant dense<0.000000e+00> : vector<64x512xf32>
    %2 = tpu.matmul %0, %1, %cst {dimension_numbers = #tpu.dot_dimension_numbers<[1], [0], [0], [1], [0, 0, 1, 1], [], []>} : vector<64x16xbf16>, vector<16x512xbf16>, vector<64x512xf32> -> vector<64x512xf32>
    %c0_3 = arith.constant 0 : index
    %c0_4 = arith.constant 0 : index
    %3 = vector.load %arg3[%c0_3, %c0_4] : memref<1x512xf32, #tpu.memory_space<vmem>>, vector<1x512xf32>
    %4 = vector.broadcast %3 : vector<1x512xf32> to vector<64x512xf32>
    %5 = arith.addf %2, %4 : vector<64x512xf32>
    %c0_5 = arith.constant 0 : index
    %c0_6 = arith.constant 0 : index
    %6 = vector.load %arg4[%c0_5, %c0_6] : memref<64x512xf32, #tpu.memory_space<vmem>>, vector<64x512xf32>
    tpu.vector_store %arg4[%c0_5, %c0_6], %5 {strides = array<i32>} : memref<64x512xf32, #tpu.memory_space<vmem>>, vector<64x512xf32>,
    return
  }
  func.func @transform_0(%arg0: i32) -> (i32, i32) {
    %c0_i32 = arith.constant 0 : i32
    %c0_i32_0 = arith.constant 0 : i32
    return %arg0, %c0_i32 : i32, i32
  }
  func.func @transform_1(%arg0: i32) -> (i32, i32) {
    %c0_i32 = arith.constant 0 : i32
    %c0_i32_0 = arith.constant 0 : i32
    %c0_i32_1 = arith.constant 0 : i32
    return %c0_i32, %c0_i32_0 : i32, i32
  }
  func.func @transform_2(%arg0: i32) -> (i32, i32) {
    %c0_i32 = arith.constant 0 : i32
    %c0_i32_0 = arith.constant 0 : i32
    %c0_i32_1 = arith.constant 0 : i32
    return %c0_i32, %c0_i32_0 : i32, i32
  }
  func.func @transform_3(%arg0: i32) -> (i32, i32) {
    %c0_i32 = arith.constant 0 : i32
    %c0_i32_0 = arith.constant 0 : i32
    return %arg0, %c0_i32 : i32, i32
  }
}

</mosaic_0001>

<bundles_post_ra>
// kernel: tpu_custom_call.1
= control target key start
LH: loop header
LB: loop body
LE: loop exit
PB: predicated region body
PF: predicated region fallthrough
CT: control target
= control target key end

     0   :  { %v351_v2 = vmov 0   ;;  %vm90_vm0 = vcmask 130048   ;;  %s462_s0 = inlined_call_operand.vmem [shape: bf16[64,16], index: 0, kind: input, shape index: {}]   ;;  %s463_s1 = inlined_call_operand.vmem [shape: bf16[16,512], index: 1, kind: input, shape index: {}]   ;;  %s464_s2 = inlined_call_operand.vmem [shape: f32[1,512], index: 2, kind: input, shape index: {}]   ;;  %s465_s3 = inlined_call_operand.hbm [shape: f32[64,512], index: 3, kind: output, shape index: {}]  }
   0x1   :  { %v317_v0 = vld [vmem:[%s463_s1 + $0x4] ss:$16 sps:$4 sm:$0xff]   ;;  %v319_v1 = vld [vmem:[%s463_s1 + $0xc] ss:$16 sps:$4 sm:$0xff]   ;;  %135 = vmatprep.mubr.bf16.mxu0 %v351_v2  ;;  %208 = vmatprep.mubr.bf16.mxu1 %v351_v2  ;;  %v321_v3 = vld [vmem:[%s463_s1] ss:$16 sps:$4 sm:$0xff]  }
   0x2   :  { %103 = vmatprep.subr.bf16.mxu0 %v317_v0  ;;  %v322_v4 = vld [vmem:[%s463_s1 + $0x8] ss:$16 sps:$4 sm:$0xff]   ;;  %176 = vmatprep.subr.bf16.mxu1 %v319_v1  ;;  %v323_v5 = vld [vmem:[%s462_s0] sm:$0xff]  }
   0x3   :  { %104 = vmatpush1.bf16.msra.mxu0 %v321_v3  ;;  %177 = vmatpush1.bf16.msra.mxu1 %v322_v4 }
   0x6   :  { %305 = vmatmul.mubr.msk.bf16.vlgmr.msra.gmra.mrb[0].mxu0 %vm90_vm0, %v323_v5  ;;  %309 = vmatmul.mubr.msk.bf16.vlgmr.msra.gmra.mrb[0].mxu1 %vm90_vm0, %v323_v5 }
   0x7   :  { %8 = vsyncpa [#allocation3], 0  ;;  %145 = vmatprep.mubr.bf16.mxu0 %v351_v2  ;;  %218 = vmatprep.mubr.bf16.mxu1 %v351_v2  ;;  %v324_v6 = vld [vmem:[%s462_s0 + $0x8] sm:$0xff]   ;;  %v325_v7 = vld [vmem:[%s462_s0 + $0x10] sm:$0xff]   ;;  %v30_v9 = vlaneseq }
   0x8   :  { %v326_v8 = vld [vmem:[%s462_s0 + $0x18] sm:$0xff]   ;;  %v28_v13 = vld [vmem:[%s464_s2] sm:$0xf]  ;;  %s352_s0 = smov [#allocation2]  }
   0x9   :  { %v31_v10 = vshrl.u32 %v30_v9, 7  ;;  %s286_s2 = sshll.u32 %s352_s0, 4  ;;  %s287_s2 = int_to_ptr.vmem [resolvable:$true] %s286_s2 }
   0xa   :  { %s327_s29 = scalar_lea.vmem %s287_s2, 4096  ;;  %p332_p1 = scmp.lt.s32.totalorder %s287_s2, %s287_s2 }
   0xb   :  { %v32_v11 = vsub.s32 0, %v31_v10  ;;  %v40_v12 = vsub.s32 2, %v31_v10  ;;  %v36_v14 = vsub.s32 1, %v31_v10  ;;  %v44_v15 = vsub.s32 3, %v31_v10  ;;  %p328_p0 = scmp.ne.s32.totalorder %s287_s2, %s327_s29  ;;  %p333_p2 = scmp.lt.s32.totalorder %s327_s29, %s327_s29 }
   0xd   :  { %v410_v16 = vrot.slane %v28_v13, %v32_v11  ;;  %v412_v17 = vrot.slane %v28_v13, %v40_v12  ;;  %v414_v18 = vrot.slane %v28_v13, %v36_v14  ;;  %v416_v19 = vrot.slane %v28_v13, %v44_v15  ;;  %p334_p3 = por %p333_p2, %p332_p1 }
   0xe   :  { %306 = vmatmul.mubr.msk.bf16.gmra.mrb[4].mxu0 %vm90_vm0, %v324_v6  ;;  %310 = vmatmul.mubr.msk.bf16.gmra.mrb[4].mxu1 %vm90_vm0, %v324_v6 }
   0xf   :  { %155 = vmatprep.mubr.bf16.mxu0 %v351_v2  ;;  %228 = vmatprep.mubr.bf16.mxu1 %v351_v2  ;;  %p335_p4 = pnand %p334_p3, %p328_p0 }
  0x16   :  { %307 = vmatmul.mubr.msk.bf16.gmra.mrb[8].mxu0 %vm90_vm0, %v325_v7  ;;  %311 = vmatmul.mubr.msk.bf16.gmra.mrb[8].mxu1 %vm90_vm0, %v325_v7 }
  0x17   :  { %165 = vmatprep.mubr.bf16.mxu0 %v351_v2  ;;  %238 = vmatprep.mubr.bf16.mxu1 %v351_v2 }
  0x1e   :  { %308 = vmatmul.mubr.msk.bf16.gmra.mrb[12].mxu0 %vm90_vm0, %v326_v8  ;;  %312 = vmatmul.mubr.msk.bf16.gmra.mrb[12].mxu1 %vm90_vm0, %v326_v8 }
  0xd9   :  { %v137_v20 = vpop.f32.mrb[0].mxu0  ;;  %v210_v21 = vpop.f32.mrb[0].mxu1 }
  0xda   :  { %v138_v22 = vadd.f32 %v137_v20, %v410_v16  ;;  %v211_v23 = vadd.f32 %v210_v21, %v412_v17  ;;  %v139_v24 = vpop.f32.mrb[1].mxu0  ;;  %v212_v25 = vpop.f32.mrb[1].mxu1 }
  0xdb   :  { %v140_v26 = vadd.f32 %v139_v24, %v414_v18  ;;  %v213_v27 = vadd.f32 %v212_v25, %v416_v19  ;;  %v141_v28 = vpop.f32.mrb[2].mxu0  ;;  %v214_v29 = vpop.f32.mrb[2].mxu1 }
  0xdc   :  { %249 = vst [vmem:[#allocation2] sm:$0xff] %v138_v22  ;;  %251 = vst [vmem:[#allocation2 + $0x10] sm:$0xff] %v211_v23  ;;  %v142_v30 = vadd.f32 %v141_v28, %v410_v16  ;;  %v215_v31 = vadd.f32 %v214_v29, %v412_v17  ;;  %v143_v32 = vpop.f32.mrb[3].mxu0  ;;  %v216_v33 = vpop.f32.mrb[3].mxu1 }
  0xdd   :  { %250 = vst [vmem:[#allocation2 + $0x8] sm:$0xff] %v140_v26  ;;  %252 = vst [vmem:[#allocation2 + $0x18] sm:$0xff] %v213_v27  ;;  %v144_v34 = vadd.f32 %v143_v32, %v414_v18  ;;  %v217_v35 = vadd.f32 %v216_v33, %v416_v19 }
  0xde   :  { %253 = vst [vmem:[#allocation2 + $0x20] sm:$0xff] %v142_v30  ;;  %255 = vst [vmem:[#allocation2 + $0x30] sm:$0xff] %v215_v31 }
  0xdf   :  { %254 = vst [vmem:[#allocation2 + $0x28] sm:$0xff] %v144_v34  ;;  %256 = vst [vmem:[#allocation2 + $0x38] sm:$0xff] %v217_v35 }
  0xe1   :  { %v147_v36 = vpop.f32.mrb[4].mxu0  ;;  %v220_v37 = vpop.f32.mrb[4].mxu1 }
  0xe2   :  { %v148_v38 = vadd.f32 %v147_v36, %v410_v16  ;;  %v221_v39 = vadd.f32 %v220_v37, %v412_v17  ;;  %v149_v40 = vpop.f32.mrb[5].mxu0  ;;  %v222_v41 = vpop.f32.mrb[5].mxu1 }
  0xe3   :  { %v150_v42 = vadd.f32 %v149_v40, %v414_v18  ;;  %v223_v43 = vadd.f32 %v222_v41, %v416_v19  ;;  %v151_v44 = vpop.f32.mrb[6].mxu0  ;;  %v224_v45 = vpop.f32.mrb[6].mxu1 }
  0xe4   :  { %257 = vst [vmem:[#allocation2 + $0x40] sm:$0xff] %v148_v38  ;;  %259 = vst [vmem:[#allocation2 + $0x50] sm:$0xff] %v221_v39  ;;  %v152_v46 = vadd.f32 %v151_v44, %v410_v16  ;;  %v225_v47 = vadd.f32 %v224_v45, %v412_v17  ;;  %v153_v48 = vpop.f32.mrb[7].mxu0  ;;  %v226_v49 = vpop.f32.mrb[7].mxu1 }
  0xe5   :  { %258 = vst [vmem:[#allocation2 + $0x48] sm:$0xff] %v150_v42  ;;  %260 = vst [vmem:[#allocation2 + $0x58] sm:$0xff] %v223_v43  ;;  %v154_v50 = vadd.f32 %v153_v48, %v414_v18  ;;  %v227_v51 = vadd.f32 %v226_v49, %v416_v19 }
  0xe6   :  { %261 = vst [vmem:[#allocation2 + $0x60] sm:$0xff] %v152_v46  ;;  %263 = vst [vmem:[#allocation2 + $0x70] sm:$0xff] %v225_v47 }
  0xe7   :  { %262 = vst [vmem:[#allocation2 + $0x68] sm:$0xff] %v154_v50  ;;  %264 = vst [vmem:[#allocation2 + $0x78] sm:$0xff] %v227_v51 }
  0xe9   :  { %v157_v52 = vpop.f32.mrb[8].mxu0  ;;  %v230_v53 = vpop.f32.mrb[8].mxu1 }
  0xea   :  { %v158_v54 = vadd.f32 %v157_v52, %v410_v16  ;;  %v231_v55 = vadd.f32 %v230_v53, %v412_v17  ;;  %v159_v56 = vpop.f32.mrb[9].mxu0  ;;  %v232_v57 = vpop.f32.mrb[9].mxu1 }
  0xeb   :  { %v160_v58 = vadd.f32 %v159_v56, %v414_v18  ;;  %v233_v59 = vadd.f32 %v232_v57, %v416_v19  ;;  %v161_v60 = vpop.f32.mrb[10].mxu0  ;;  %v234_v61 = vpop.f32.mrb[10].mxu1 }
  0xec   :  { %265 = vst [vmem:[#allocation2 + $0x80] sm:$0xff] %v158_v54  ;;  %267 = vst [vmem:[#allocation2 + $0x90] sm:$0xff] %v231_v55  ;;  %v162_v62 = vadd.f32 %v161_v60, %v410_v16  ;;  %v235_v63 = vadd.f32 %v234_v61, %v412_v17  ;;  %v163_v0 = vpop.f32.mrb[11].mxu0  ;;  %v236_v1 = vpop.f32.mrb[11].mxu1 }
  0xed   :  { %266 = vst [vmem:[#allocation2 + $0x88] sm:$0xff] %v160_v58  ;;  %268 = vst [vmem:[#allocation2 + $0x98] sm:$0xff] %v233_v59  ;;  %v164_v2 = vadd.f32 %v163_v0, %v414_v18  ;;  %v237_v3 = vadd.f32 %v236_v1, %v416_v19 }
  0xee   :  { %269 = vst [vmem:[#allocation2 + $0xa0] sm:$0xff] %v162_v62  ;;  %271 = vst [vmem:[#allocation2 + $0xb0] sm:$0xff] %v235_v63 }
  0xef   :  { %270 = vst [vmem:[#allocation2 + $0xa8] sm:$0xff] %v164_v2  ;;  %272 = vst [vmem:[#allocation2 + $0xb8] sm:$0xff] %v237_v3 }
  0xf1   :  { %v167_v4 = vpop.f32.mrb[12].mxu0  ;;  %v240_v5 = vpop.f32.mrb[12].mxu1 }
  0xf2   :  { %v168_v6 = vadd.f32 %v167_v4, %v410_v16  ;;  %v241_v7 = vadd.f32 %v240_v5, %v412_v17  ;;  %v169_v8 = vpop.f32.mrb[13].mxu0  ;;  %v242_v9 = vpop.f32.mrb[13].mxu1 }
  0xf3   :  { %v170_v10 = vadd.f32 %v169_v8, %v414_v18  ;;  %v243_v11 = vadd.f32 %v242_v9, %v416_v19  ;;  %v171_v12 = vpop.f32.mrb[14].mxu0  ;;  %v244_v13 = vpop.f32.mrb[14].mxu1 }
  0xf4   :  { %273 = vst [vmem:[#allocation2 + $0xc0] sm:$0xff] %v168_v6  ;;  %275 = vst [vmem:[#allocation2 + $0xd0] sm:$0xff] %v241_v7  ;;  %v172_v14 = vadd.f32 %v171_v12, %v410_v16  ;;  %v245_v15 = vadd.f32 %v244_v13, %v412_v17  ;;  %v173_v20 = vpop.f32.mrb[15].mxu0  ;;  %v246_v21 = vpop.f32.mrb[15].mxu1 }
  0xf5   :  { %274 = vst [vmem:[#allocation2 + $0xc8] sm:$0xff] %v170_v10  ;;  %276 = vst [vmem:[#allocation2 + $0xd8] sm:$0xff] %v243_v11  ;;  %v174_v22 = vadd.f32 %v173_v20, %v414_v18  ;;  %v247_v23 = vadd.f32 %v246_v21, %v416_v19 }
  0xf6   :  { %277 = vst [vmem:[#allocation2 + $0xe0] sm:$0xff] %v172_v14  ;;  %279 = vst [vmem:[#allocation2 + $0xf0] sm:$0xff] %v245_v15 }
  0xf7   :  { %278 = vst [vmem:[#allocation2 + $0xe8] sm:$0xff] %v174_v22  ;;  %280 = vst [vmem:[#allocation2 + $0xf8] sm:$0xff] %v247_v23 }
  0xf8   :  { %338 = shalt.err (!%p335_p4)
}
  0xf9   :  { %s339_s5 = scalar_lea.hbm %s465_s3, 4096 }
  0xfa   :  { %p340_p5 = scmp.ne.s32.totalorder %s465_s3, %s339_s5  ;;  %p343_p6 = scmp.lt.u32.totalorder %s339_s5, %s465_s3 }
  0xfc   :  { %p345_p7 = pnand %p343_p6, %p340_p5 }
  0xfe   :  { %348 = shalt.err (!%p345_p7)
}
  0xff   :  { %s353_s10 = smov 512   ;;  %s354_s11 = smov 32  }
 0x100   :  { %292 = dma.vmem_to_hbm [thread:$0]  %s287_s2, 4096, %s465_s3, [#allocation3], %s353_s10, %s353_s10, %s354_s11  }
 0x101   :  { %349 = dma.done.wait [#allocation3], 4096  }
 0x102   :  { %350 = vsyncadd [#allocation3], 4294963200 }
 0x103   :  { %296 = vsyncpa [#allocation3], 1 }

</bundles_post_ra>
